<compile_context>
chip_gen: v7x
topology: tpu7x:2x2x1
jax: 0.10.0
libtpu: 0.0.40
codegen_flags: <defaults>
</compile_context>

<pallas_src>
import functools

import jax
import jax.numpy as jnp
from jax.experimental import pallas as pl
from jax.experimental.pallas import tpu as pltpu


_DEFAULT_BLOCK_BUDGET = 4 * 1024 * 1024   # ~4 MiB input block target
_VMEM_LIMIT_CAP = 48 * 1024 * 1024        # stay well under v7x 64 MiB physical
_LANE = 128


def _precise_reciprocal(x):
    """EUP approximate reciprocal + one Newton step -> ~f32-exact 1/x."""
    r = pl.reciprocal(x, approx=True)
    return r * (2.0 - x * r)


# ---------------------------------------------------------------------------
# Fused single-pass kernel: whole spatial extent (and BT batch elems) per step
# ---------------------------------------------------------------------------
def _grn_fused_kernel(x_ref, g_ref, b_ref, o_ref, *, eps, c_orig):
    """x_ref/o_ref: (BT, HW, C); g_ref/b_ref: (1, C)."""
    # Spatial sum-of-squares, accumulated in f32 (per-use cast: a bf16 input
    # does not pin a full f32 copy of the slab across both phases).
    xf = x_ref[...].astype(jnp.float32)
    ss = jnp.sum(xf * xf, axis=1, keepdims=True)               # (BT, 1, C)
    gx = jnp.sqrt(ss)
    # Channel mean over the ORIGINAL channel count (padded channels are zero).
    denom = jnp.sum(gx, axis=-1, keepdims=True) * (1.0 / c_orig) + eps
    nx = gx * _precise_reciprocal(denom)                        # (BT, 1, C)
    scale = g_ref[...].astype(jnp.float32) * nx + 1.0           # (BT, 1, C)
    # Apply: re-read x and promote per-vreg.
    out = x_ref[...].astype(jnp.float32) * scale + b_ref[...].astype(jnp.float32)
    o_ref[...] = out.astype(o_ref.dtype)


# ---------------------------------------------------------------------------
# Two-pass HW-tiled kernels (large feature maps that don't fit a VMEM block)
# ---------------------------------------------------------------------------
def _grn_norm_kernel(x_ref, g_ref, s_ref, acc_ref, *, eps, c_orig):
    """Pass 1: accumulate sum(x^2) over HW tiles, emit scale = gamma*Nx + 1.

    x_ref: (THW, C) tile; g_ref: (1, C); s_ref: (1, C) out; acc_ref: (1, C).
    """
    h = pl.program_id(1)

    @pl.when(h == 0)
    def _init():
        acc_ref[...] = jnp.zeros_like(acc_ref)

    x = x_ref[...].astype(jnp.float32)
    acc_ref[...] += jnp.sum(x * x, axis=0, keepdims=True)

    @pl.when(h == pl.num_programs(1) - 1)
    def _finalize():
        gx = jnp.sqrt(acc_ref[...])                             # (1, C)
        denom = jnp.sum(gx, axis=-1, keepdims=True) * (1.0 / c_orig) + eps
        nx = gx * _precise_reciprocal(denom)
        s_ref[...] = g_ref[...].astype(jnp.float32) * nx + 1.0


def _grn_apply_kernel(x_ref, s_ref, b_ref, o_ref):
    """Pass 2: o = scale * x + beta, streaming one (THW, C) tile per step."""
    out = x_ref[...].astype(jnp.float32) * s_ref[...] + b_ref[...].astype(jnp.float32)
    o_ref[...] = out.astype(o_ref.dtype)


# ---------------------------------------------------------------------------
# Wrapper
# ---------------------------------------------------------------------------
def _largest_hw_tile(hw, max_rows):
    """Largest multiple-of-8 divisor of hw that is <= max_rows (or None)."""
    best = None
    upper = min(hw, max_rows)
    d = 8
    while d <= upper:
        if hw % d == 0:
            best = d
        d += 8
    return best


def grn_nhwc_forward(x, gamma, beta, eps=1e-6, *,
                     block_budget_bytes=_DEFAULT_BLOCK_BUDGET):
    """Forward pass of GRNwithNHWC (use_bias=True).

    x: (B, H, W, C) NHWC; gamma, beta: (1, 1, 1, C).
    Returns (gamma * Nx + 1) * x + beta  with Nx = Gx / (mean_C(Gx) + eps),
    Gx = ||x||_2 over the spatial dims.
    """
    B, H, W, C = x.shape
    HW = H * W

    # Lane-dense channels: pad C to a multiple of 128 outside the kernel so
    # stores stay unmasked. Padded gamma/beta are 0 and padded x is 0, so the
    # padded output channels are 0 and are sliced off at the end; the channel
    # mean inside the kernel divides by the original C.
    C_pad = ((C + _LANE - 1) // _LANE) * _LANE
    x_flat = x.reshape(B, HW, C)        # contiguous NHWC -> free reshape
    g2 = gamma.reshape(1, C)
    b2 = beta.reshape(1, C)
    if C_pad != C:
        x_flat = jnp.pad(x_flat, ((0, 0), (0, 0), (0, C_pad - C)))
        g2 = jnp.pad(g2, ((0, 0), (0, C_pad - C)))
        b2 = jnp.pad(b2, ((0, 0), (0, C_pad - C)))

    itemsize = x.dtype.itemsize
    slab_bytes = HW * C_pad * itemsize  # one batch element

    if slab_bytes <= block_budget_bytes:
        # ---------------- fused single-pass path ----------------
        # Merge batch elements into one block (amortize ~0.35 us/step against
        # the HBM roofline) but keep >= min(B, 8) grid steps so both v7x
        # TensorCores get work and input/output DMAs can pipeline.
        target_steps = min(B, 8)
        bt_cap = max(1, min(B // target_steps, block_budget_bytes // slab_bytes))
        BT = 1
        for d in range(1, bt_cap + 1):
            if B % d == 0:
                BT = d
        grid = (B // BT,)

        block_f32_bytes = BT * HW * C_pad * 4
        vmem_limit = int(min(_VMEM_LIMIT_CAP,
                             max(16 * 1024 * 1024, 8 * block_f32_bytes)))

        kernel = functools.partial(_grn_fused_kernel, eps=eps, c_orig=C)
        out = pl.pallas_call(
            kernel,
            out_shape=jax.ShapeDtypeStruct((B, HW, C_pad), x.dtype),
            grid_spec=pltpu.PrefetchScalarGridSpec(
                num_scalar_prefetch=0,
                grid=grid,
                in_specs=[
                    pl.BlockSpec((BT, HW, C_pad), lambda i: (i, 0, 0)),
                    pl.BlockSpec((1, C_pad), lambda i: (0, 0)),
                    pl.BlockSpec((1, C_pad), lambda i: (0, 0)),
                ],
                out_specs=pl.BlockSpec((BT, HW, C_pad), lambda i: (i, 0, 0)),
            ),
            compiler_params=pltpu.CompilerParams(
                dimension_semantics=("parallel",),
                vmem_limit_bytes=vmem_limit,
            ),
        )(x_flat, g2, b2)
    else:
        # ---------------- two-pass HW-tiled path ----------------
        max_rows = max(8, block_budget_bytes // (C_pad * itemsize))
        thw = _largest_hw_tile(HW, max_rows)
        if thw is None:
            # No multiple-of-8 divisor of HW: fall back to the full slab.
            thw = HW
        n_hw = HW // thw

        block_f32_bytes = thw * C_pad * 4
        vmem_limit = int(min(_VMEM_LIMIT_CAP,
                             max(16 * 1024 * 1024, 8 * block_f32_bytes)))

        # Pass 1: per-(batch, channel) spatial L2 norm -> scale (B, 1, C_pad).
        norm_kernel = functools.partial(_grn_norm_kernel, eps=eps, c_orig=C)
        scale = pl.pallas_call(
            norm_kernel,
            out_shape=jax.ShapeDtypeStruct((B, 1, C_pad), jnp.float32),
            grid_spec=pltpu.PrefetchScalarGridSpec(
                num_scalar_prefetch=0,
                grid=(B, n_hw),
                in_specs=[
                    pl.BlockSpec((None, thw, C_pad), lambda b, h: (b, h, 0)),
                    pl.BlockSpec((1, C_pad), lambda b, h: (0, 0)),
                ],
                out_specs=pl.BlockSpec((None, 1, C_pad), lambda b, h: (b, 0, 0)),
                scratch_shapes=[pltpu.VMEM((1, C_pad), jnp.float32)],
            ),
            compiler_params=pltpu.CompilerParams(
                dimension_semantics=("parallel", "arbitrary"),
                vmem_limit_bytes=vmem_limit,
            ),
        )(x_flat, g2)

        # Pass 2: streaming apply out = scale * x + beta.
        out = pl.pallas_call(
            _grn_apply_kernel,
            out_shape=jax.ShapeDtypeStruct((B, HW, C_pad), x.dtype),
            grid_spec=pltpu.PrefetchScalarGridSpec(
                num_scalar_prefetch=0,
                grid=(B, n_hw),
                in_specs=[
                    pl.BlockSpec((None, thw, C_pad), lambda b, h: (b, h, 0)),
                    pl.BlockSpec((None, 1, C_pad), lambda b, h: (b, 0, 0)),
                    pl.BlockSpec((1, C_pad), lambda b, h: (0, 0)),
                ],
                out_specs=pl.BlockSpec((None, thw, C_pad), lambda b, h: (b, h, 0)),
            ),
            compiler_params=pltpu.CompilerParams(
                dimension_semantics=("parallel", "parallel"),
                vmem_limit_bytes=vmem_limit,
            ),
        )(x_flat, scale, b2)

    if C_pad != C:
        out = out[..., :C]
    return out.reshape(B, H, W, C)


def _reference(x, gamma, beta, eps=1e-6):
    """Pure-JAX reference matching the PyTorch GRNwithNHWC forward."""
    gx = jnp.sqrt(jnp.sum(x * x, axis=(1, 2), keepdims=True))      # (B,1,1,C)
    nx = gx / (jnp.mean(gx, axis=-1, keepdims=True) + eps)         # (B,1,1,C)
    return (gamma * nx + 1.0) * x + beta


if __name__ == "__main__":
    # GRNwithNHWC(dim=128): B=2, H=W=16 spatial, 128 channels (lane-dense).
    B, H, W, C = 2, 16, 16, 128

    key = jax.random.PRNGKey(0)
    kx, kg, kb = jax.random.split(key, 3)

    x = jax.random.normal(kx, (B, H, W, C), dtype=jnp.float32)
    # gamma/beta are zero-initialized in the module; use random values so the
    # GRN math is actually exercised (matches a trained module's forward).
    gamma = jax.random.normal(kg, (1, 1, 1, C), dtype=jnp.float32) * 0.1
    beta = jax.random.normal(kb, (1, 1, 1, C), dtype=jnp.float32) * 0.1

    ref = _reference(x, gamma, beta)

    # Fused single-pass path (small feature map -> whole slab per grid step).
    out = jax.block_until_ready(grn_nhwc_forward(x, gamma, beta))
    assert out.shape == (B, H, W, C), out.shape
    assert jnp.allclose(out, ref, atol=1e-4, rtol=1e-4), "fused path mismatch"

    # Two-pass HW-tiled path (used for large feature maps); force it here with
    # a tiny block budget so both code paths are exercised on TPU.
    out2 = jax.block_until_ready(
        grn_nhwc_forward(x, gamma, beta, block_budget_bytes=32 * 1024))
    assert out2.shape == (B, H, W, C), out2.shape
    assert jnp.allclose(out2, ref, atol=1e-4, rtol=1e-4), "two-pass path mismatch"

    print("KERNEL_OK")
</pallas_src>

<mosaic_0001>
module attributes {stable_mosaic.version = 11 : i64} {
  func.func @_grn_fused_kernel(%arg0: i32, %arg1: memref<1x256x128xf32, #tpu.memory_space<vmem>>, %arg2: memref<1x128xf32, #tpu.memory_space<vmem>>, %arg3: memref<1x128xf32, #tpu.memory_space<vmem>>, %arg4: memref<1x256x128xf32, #tpu.memory_space<vmem>>) attributes {dimension_semantics = [#tpu.dimension_semantics<parallel>], iteration_bounds = array<i64: 2>, scalar_prefetch = 0 : i64, scratch_operands = 0 : i64, tpu.core_type = #tpu.core_type<tc>, window_params = [{transform_indices = @transform_0, window_bounds = array<i64: 1, 256, 128>}, {pipeline_mode = #tpu.pipeline_mode<synchronous>, transform_indices = @transform_1, window_bounds = array<i64: 1, 128>}, {pipeline_mode = #tpu.pipeline_mode<synchronous>, transform_indices = @transform_2, window_bounds = array<i64: 1, 128>}, {transform_indices = @transform_3, window_bounds = array<i64: 1, 256, 128>}]} {
    %c0 = arith.constant 0 : index
    %c0_0 = arith.constant 0 : index
    %c0_1 = arith.constant 0 : index
    %0 = vector.load %arg1[%c0, %c0_0, %c0_1] : memref<1x256x128xf32, #tpu.memory_space<vmem>>, vector<1x256x128xf32>
    %1 = arith.mulf %0, %0 : vector<1x256x128xf32>
    %cst = arith.constant dense<0.000000e+00> : vector<1x128xf32>
    %2 = vector.multi_reduction <add>, %1, %cst [1] : vector<1x256x128xf32> to vector<1x128xf32>
    %3 = vector.shape_cast %2 : vector<1x128xf32> to vector<1x1x128xf32>
    %4 = math.sqrt %3 : vector<1x1x128xf32>
    %cst_2 = arith.constant dense<0.000000e+00> : vector<1x1xf32>
    %5 = vector.multi_reduction <add>, %4, %cst_2 [2] : vector<1x1x128xf32> to vector<1x1xf32>
    %6 = vector.shape_cast %5 : vector<1x1xf32> to vector<1x1x1xf32>
    %cst_3 = arith.constant 7.812500e-03 : f32
    %7 = vector.broadcast %cst_3 : f32 to vector<1x1x1xf32>
    %8 = arith.mulf %6, %7 : vector<1x1x1xf32>
    %cst_4 = arith.constant 9.99999997E-7 : f32
    %9 = vector.broadcast %cst_4 : f32 to vector<1x1x1xf32>
    %10 = arith.addf %8, %9 : vector<1x1x1xf32>
    %11 = tpu.reciprocal %10 {approx = true} : vector<1x1x1xf32> -> vector<1x1x1xf32>
    %12 = arith.mulf %10, %11 : vector<1x1x1xf32>
    %cst_5 = arith.constant 2.000000e+00 : f32
    %13 = vector.broadcast %cst_5 : f32 to vector<1x1x1xf32>
    %14 = arith.subf %13, %12 : vector<1x1x1xf32>
    %15 = arith.mulf %11, %14 : vector<1x1x1xf32>
    %16 = vector.broadcast %15 : vector<1x1x1xf32> to vector<1x1x128xf32>
    %17 = arith.mulf %4, %16 : vector<1x1x128xf32>
    %c0_6 = arith.constant 0 : index
    %c0_7 = arith.constant 0 : index
    %18 = vector.load %arg2[%c0_6, %c0_7] : memref<1x128xf32, #tpu.memory_space<vmem>>, vector<1x128xf32>
    %19 = vector.shape_cast %18 : vector<1x128xf32> to vector<1x1x128xf32>
    %20 = arith.mulf %19, %17 : vector<1x1x128xf32>
    %cst_8 = arith.constant 1.000000e+00 : f32
    %21 = vector.broadcast %cst_8 : f32 to vector<1x1x128xf32>
    %22 = arith.addf %20, %21 : vector<1x1x128xf32>
    %c0_9 = arith.constant 0 : index
    %c0_10 = arith.constant 0 : index
    %c0_11 = arith.constant 0 : index
    %23 = vector.load %arg1[%c0_9, %c0_10, %c0_11] : memref<1x256x128xf32, #tpu.memory_space<vmem>>, vector<1x256x128xf32>
    %24 = vector.broadcast %22 : vector<1x1x128xf32> to vector<1x256x128xf32>
    %25 = arith.mulf %23, %24 : vector<1x256x128xf32>
    %c0_12 = arith.constant 0 : index
    %c0_13 = arith.constant 0 : index
    %26 = vector.load %arg3[%c0_12, %c0_13] : memref<1x128xf32, #tpu.memory_space<vmem>>, vector<1x128xf32>
    %27 = vector.shape_cast %26 : vector<1x128xf32> to vector<1x1x128xf32>
    %28 = vector.broadcast %27 : vector<1x1x128xf32> to vector<1x256x128xf32>
    %29 = arith.addf %25, %28 : vector<1x256x128xf32>
    %c0_14 = arith.constant 0 : index
    %c0_15 = arith.constant 0 : index
    %c0_16 = arith.constant 0 : index
    %30 = vector.load %arg4[%c0_14, %c0_15, %c0_16] : memref<1x256x128xf32, #tpu.memory_space<vmem>>, vector<1x256x128xf32>
    tpu.vector_store %arg4[%c0_14, %c0_15, %c0_16], %29 {strides = array<i32>} : memref<1x256x128xf32, #tpu.memory_space<vmem>>, vector<1x256x128xf32>,
    return
  }
  func.func @transform_0(%arg0: i32) -> (i32, i32, i32) {
    %c0_i32 = arith.constant 0 : i32
    %c0_i32_0 = arith.constant 0 : i32
    %c0_i32_1 = arith.constant 0 : i32
    return %arg0, %c0_i32, %c0_i32_0 : i32, i32, i32
  }
  func.func @transform_1(%arg0: i32) -> (i32, i32) {
    %c0_i32 = arith.constant 0 : i32
    %c0_i32_0 = arith.constant 0 : i32
    %c0_i32_1 = arith.constant 0 : i32
    return %c0_i32, %c0_i32_0 : i32, i32
  }
  func.func @transform_2(%arg0: i32) -> (i32, i32) {
    %c0_i32 = arith.constant 0 : i32
    %c0_i32_0 = arith.constant 0 : i32
    %c0_i32_1 = arith.constant 0 : i32
    return %c0_i32, %c0_i32_0 : i32, i32
  }
  func.func @transform_3(%arg0: i32) -> (i32, i32, i32) {
    %c0_i32 = arith.constant 0 : i32
    %c0_i32_0 = arith.constant 0 : i32
    %c0_i32_1 = arith.constant 0 : i32
    return %arg0, %c0_i32, %c0_i32_0 : i32, i32, i32
  }
}

</mosaic_0001>

<bundles_post_ra>
// kernel: tpu_custom_call.1
= control target key start
LH: loop header
LB: loop body
LE: loop exit
PB: predicated region body
PF: predicated region fallthrough
CT: control target
= control target key end

     0   :  { %8 = vsyncpa [#allocation3], 0  ;;  %s1135_s0 = inlined_call_operand.hbm [shape: f32[2,256,128], index: 0, kind: input, shape index: {}]   ;;  %s1136_s1 = inlined_call_operand.vmem [shape: f32[1,128], index: 1, kind: input, shape index: {}]   ;;  %s1137_s2 = inlined_call_operand.vmem [shape: f32[1,128], index: 2, kind: input, shape index: {}]   ;;  %s1138_s3 = inlined_call_operand.hbm [shape: f32[2,256,128], index: 3, kind: output, shape index: {}]  }
   0x1   :  { %10 = vsyncpa [#allocation3 + $0x1], 0 }
   0x2   :  { %11 = vsyncpa [#allocation4], 0 }
   0x3   :  { %13 = vsyncpa [#allocation4 + $0x1], 0  ;;  %s700_s12 = smov 0   ;;  %s702_s13 = smov 0  }
   0x4   :  { %s704_s14 = smov 0   ;;  %s706_s15 = smov 0  }
   0x5 LB: > { %s721_s16 = sadd.s32 4294967295, %s672_s15   ;;  %s505_s17 = sadd.s32 4294967294, %s672_s15   ;;  %s672_s15 = sphi %s706_s15, %s1151_s15   ;;  %s668_s14 = sphi %s704_s14, %s1150_s14   ;;  %s664_s13 = sphi %s702_s13, %s1149_s13   ;;  %s660_s12 = sphi %s700_s12, %s1148_s12  }
   0x6   : > { %s725_s18 = sadd.s32 1, %s672_s15   ;;  %s26_s19 = sadd.s32 1, %s668_s14 }
   0x7   : > { %s23_s20 = ssub.s32 %s672_s15, %s725_s18  ;;  %p33_p0 = scmp.ne.s32.totalorder %s668_s14, %s664_s13 }
   0x8   : > { %p24_p1 = scmp.eq.s32.totalorder %s23_s20, 0  ;;  %p34_p2 = scmp.eq.s32.totalorder %s672_s15, 0 }
   0x9   : > { %p39_p3 = scmp.ne.s32.totalorder %s664_s13, %s660_s12  ;;  %p40_p4 = scmp.eq.s32.totalorder %s721_s16, 0 }
   0xa   : > { %s737_s21 = scalar_select %p24_p1, %s668_s14, %s26_s19  }
   0xb   : > { %p739_p5 = por %p34_p2, %p33_p0  ;;  %p743_p6 = por %p40_p4, %p39_p3 }
   0xc   : > { %p105_p7 = scmp.eq.s32.totalorder %s721_s16, 1  ;;  %p111_p8 = scmp.eq.s32.totalorder %s505_s17, 1 }
   0xd   : > { %p534_p10 = scmp.lt.s32.totalorder %s672_s15, 2  ;;  %s137_s26 = sand.u32 1, %s668_s14  }
   0xe   : > { %p750_p11 = por %p105_p7, %p33_p0  ;;  %p754_p12 = por %p111_p8, %p39_p3 }
   0xf   : > { %s520_s27 = sshll.u32 %s672_s15, 12  ;;  %s508_s28 = sshll.u32 %s137_s26, 8 }
  0x10   : > { %s1142_s24 = scalar_select %p750_p11, 1, 0 }
  0x11   : > { %s1143_s25 = scalar_select %p754_p12, 1, 0 }
  0x12   : > { %s763_s4 = scalar_lea.hbm %s1135_s0, %s520_s27  ;;  %s141_s5 = scalar_lea.vmem [#allocation2], %s508_s28 }
  0x13   : > { %s148_s6 = sshll.u32 %s141_s5, 4  ;;  %p767_p13 = pnand %p534_p10, %p739_p5  ;;  %s771_s6 = int_to_ptr.vmem [resolvable:$true] %s148_s6 }
  0x14   : > { %s773_s8 = scalar_lea.sflag [#allocation3], %s137_s26  ;;  %s576_s9 = scalar_lea.hbm %s763_s4, 4096 }
  0x15   : > { %p577_p0 = scmp.ne.s32.totalorder %s763_s4, %s576_s9  ;;  %p578_p1 = pneg %p767_p13 }
  0x16   : > { %s581_s17 = scalar_lea.hbm %s1135_s0, 8192  ;;  %p582_p4 = scmp.lt.u32.totalorder %s763_s4, %s1135_s0 }
  0x17   : > { %p579_p2 = pnand %p578_p1, %p577_p0  ;;  %p583_p5 = scmp.lt.u32.totalorder %s581_s17, %s576_s9 }
  0x18   : > { %p585_p8 = scmp.lt.u32.totalorder %s576_s9, %s763_s4 }
  0x19   : > { %p580_p3 = pneg %p579_p2  ;;  %p584_p7 = por %p583_p5, %p582_p4 }
  0x1b   : > { %p586_p10 = por %p585_p8, %p584_p7 }
  0x1d   : > { %p587_p9 = pnand %p586_p10, %p580_p3 }
  0x1f   : > { %590 = shalt.err (!%p587_p9)
}
  0x20   : > { %s591_s22 = scalar_lea.vmem %s771_s6, 4096  ;;  %s674_s26 = smov [#allocation2]  }
  0x21   : > { %p592_p0 = scmp.ne.s32.totalorder %s771_s6, %s591_s22  ;;  %s596_s27 = sshll.u32 %s674_s26, 4  ;;  %s597_s27 = int_to_ptr.vmem [resolvable:$false] %s596_s27 }
  0x22   : > { %s598_s28 = scalar_lea.vmem %s597_s27, 8192  ;;  %p599_p11 = scmp.lt.s32.totalorder %s771_s6, %s597_s27 }
  0x23   : > { %p594_p2 = pnand %p592_p0, %p578_p1  ;;  %p600_p4 = scmp.lt.s32.totalorder %s598_s28, %s591_s22 }
  0x25   : > { %p595_p12 = pneg %p594_p2  ;;  %p601_p5 = por %p600_p4, %p599_p11 }
  0x27   : > { %p602_p7 = pnand %p601_p5, %p595_p12 }
  0x29   : > { %605 = shalt.err (!%p602_p7)
}
  0x2a   : > { %s675_s29 = smov 128   ;;  %s676_s30 = smov 8  }
  0x2b   : > { %529 = dma.hbm_to_vmem [thread:$0]  (!%p767_p13), %s763_s4, 4096, %s771_s6, %s773_s8, %s675_s29, %s675_s29, %s676_s30  }
  0x2c   : > { %p511_p9 = scmp.ge.s32.totalorder %s672_s15, 1  ;;  %p156_p1 = scmp.lt.s32.totalorder %s672_s15, 3 }
  0x2e   : > { %p157_p3 = pnand %p511_p9, %p156_p1 }
  0x2f   : > { %s804_s5 = sand.u32 (!%p157_p3), 1, %s664_s13  }
  0x30   : > { %160 = sbr.rel (%p157_p3) target bundleno = 360 (0x168), region = 32  ;;  %s512_s9 = sshll.u32 (!%p157_p3), %s804_s5, 8 }
  0x31   : > { %s163_s10 = scalar_lea.sflag (!%p157_p3), [#allocation3], %s804_s5  ;;  %s810_s11 = scalar_lea.vmem (!%p157_p3), [#allocation2], %s512_s9 }
  0x37   : > { %651 = dma.done.wait (%p743_p6), %s163_s10, 4096  }
  0x38   : > { %653 = vsyncadd (%p743_p6), %s163_s10, 4294963200  ;;  %v817_v0 = vld [vmem:[%s810_s11] sm:$0xff]  ;;  %v820_v1 = vld [vmem:[%s810_s11 + $0x8] sm:$0xff]  ;;  %s1030_s8 = scalar_lea.vmem [#allocation5], %s512_s9  ;;  %s521_s17 = sshll.u32 %s721_s16, 12 }
  0x39   : > { %v823_v2 = vld [vmem:[%s810_s11 + $0x10] sm:$0xff]  ;;  %v826_v3 = vld [vmem:[%s810_s11 + $0x18] sm:$0xff]  ;;  %v221_v4 = vmul.f32 %v817_v0, %v817_v0  ;;  %v222_v5 = vmul.f32 %v820_v1, %v820_v1  ;;  %v835_v7 = vld [vmem:[%s810_s11 + $0x20] sm:$0xff]  ;;  %s432_s19 = sshll.u32 %s1030_s8, 4  ;;  %s1073_s22 = scalar_lea.hbm %s1138_s3, %s521_s17  ;;  %s1075_s19 = int_to_ptr.vmem [resolvable:$true] %s432_s19 }
  0x3a   : > { %v223_v6 = vmul.f32 %v823_v2, %v823_v2  ;;  %v224_v8 = vmul.f32 %v826_v3, %v826_v3  ;;  %v840_v10 = vld [vmem:[%s810_s11 + $0x28] sm:$0xff]  ;;  %v225_v11 = vmul.f32 %v835_v7, %v835_v7  ;;  %v845_v13 = vld [vmem:[%s810_s11 + $0x30] sm:$0xff]  ;;  %v850_v16 = vld [vmem:[%s810_s11 + $0x38] sm:$0xff]  ;;  %s419_s26 = scalar_lea.sflag [#allocation4], %s804_s5  ;;  %s606_s27 = scalar_lea.vmem %s1075_s19, 4096 }
  0x3b   : > { %v253_v9 = vadd.f32 %v222_v5, %v221_v4  ;;  %v226_v14 = vmul.f32 %v840_v10, %v840_v10  ;;  %v227_v17 = vmul.f32 %v845_v13, %v845_v13  ;;  %v855_v19 = vld [vmem:[%s810_s11 + $0x40] sm:$0xff]  ;;  %v228_v20 = vmul.f32 %v850_v16, %v850_v16  ;;  %v860_v22 = vld [vmem:[%s810_s11 + $0x48] sm:$0xff]  ;;  %v865_v25 = vld [vmem:[%s810_s11 + $0x50] sm:$0xff]  ;;  %p607_p6 = scmp.ne.s32.totalorder %s1075_s19, %s606_s27  ;;  %p1145_p11 = scmp.ne.s32.totalorder %s1142_s24, 0 }
  0x3c   : > { %v229_v23 = vmul.f32 %v855_v19, %v855_v19  ;;  %v230_v26 = vmul.f32 %v860_v22, %v860_v22  ;;  %v870_v28 = vld [vmem:[%s810_s11 + $0x58] sm:$0xff]  ;;  %v231_v29 = vmul.f32 %v865_v25, %v865_v25  ;;  %v875_v31 = vld [vmem:[%s810_s11 + $0x60] sm:$0xff]  ;;  %v880_v34 = vld [vmem:[%s810_s11 + $0x68] sm:$0xff]  ;;  %s677_s28 = smov [#allocation5]  }
  0x3d   : > { %v254_v12 = vadd.f32 %v253_v9, %v223_v6  ;;  %v232_v32 = vmul.f32 %v870_v28, %v870_v28  ;;  %v233_v35 = vmul.f32 %v875_v31, %v875_v31  ;;  %v885_v37 = vld [vmem:[%s810_s11 + $0x70] sm:$0xff]  ;;  %v234_v38 = vmul.f32 %v880_v34, %v880_v34  ;;  %v890_v40 = vld [vmem:[%s810_s11 + $0x78] sm:$0xff]  ;;  %v895_v43 = vld [vmem:[%s810_s11 + $0x80] sm:$0xff]  ;;  %p608_p12 = pnand %p607_p6, %p1145_p11  ;;  %s610_s29 = sshll.u32 %s677_s28, 4  ;;  %s611_s29 = int_to_ptr.vmem [resolvable:$false] %s610_s29 }
  0x3e   : > { %v235_v41 = vmul.f32 %v885_v37, %v885_v37  ;;  %v236_v44 = vmul.f32 %v890_v40, %v890_v40  ;;  %v900_v46 = vld [vmem:[%s810_s11 + $0x88] sm:$0xff]  ;;  %v237_v47 = vmul.f32 %v895_v43, %v895_v43  ;;  %v905_v49 = vld [vmem:[%s810_s11 + $0x90] sm:$0xff]  ;;  %v910_v52 = vld [vmem:[%s810_s11 + $0x98] sm:$0xff]  ;;  %s612_s30 = scalar_lea.vmem %s611_s29, 8192  ;;  %p613_p8 = scmp.lt.s32.totalorder %s1075_s19, %s611_s29 }
  0x3f   : > { %v255_v15 = vadd.f32 %v254_v12, %v224_v8  ;;  %v238_v50 = vmul.f32 %v900_v46, %v900_v46  ;;  %v239_v53 = vmul.f32 %v905_v49, %v905_v49  ;;  %v915_v55 = vld [vmem:[%s810_s11 + $0xa0] sm:$0xff]  ;;  %v240_v56 = vmul.f32 %v910_v52, %v910_v52  ;;  %v920_v58 = vld [vmem:[%s810_s11 + $0xa8] sm:$0xff]  ;;  %v925_v61 = vld [vmem:[%s810_s11 + $0xb0] sm:$0xff]  ;;  %p609_p13 = pneg %p608_p12  ;;  %p614_p10 = scmp.lt.s32.totalorder %s612_s30, %s606_s27 }
  0x40   : > { %v241_v59 = vmul.f32 %v915_v55, %v915_v55  ;;  %v242_v62 = vmul.f32 %v920_v58, %v920_v58  ;;  %v930_v4 = vld [vmem:[%s810_s11 + $0xb8] sm:$0xff]  ;;  %v243_v5 = vmul.f32 %v925_v61, %v925_v61  ;;  %v935_v8 = vld [vmem:[%s810_s11 + $0xc0] sm:$0xff]  ;;  %v940_v12 = vld [vmem:[%s810_s11 + $0xc8] sm:$0xff] }
  0x41   : > { %v256_v18 = vadd.f32 %v255_v15, %v225_v11  ;;  %v244_v9 = vmul.f32 %v930_v4, %v930_v4  ;;  %p615_p0 = por %p614_p10, %p613_p8 }
  0x43   : > { %v257_v21 = vadd.f32 %v256_v18, %v226_v14  ;;  %v245_v14 = vmul.f32 %v935_v8, %v935_v8  ;;  %v246_v18 = vmul.f32 %v940_v12, %v940_v12  ;;  %p616_p2 = pnand %p615_p0, %p609_p13 }
  0x45   : > { %v258_v24 = vadd.f32 %v257_v21, %v227_v17  ;;  %v945_v17 = vld [vmem:[%s810_s11 + $0xd0] sm:$0xff]  ;;  %v950_v21 = vld [vmem:[%s810_s11 + $0xd8] sm:$0xff] }
  0x47   : > { %v259_v27 = vadd.f32 %v258_v24, %v228_v20 }
  0x49   : > { %v260_v30 = vadd.f32 %v259_v27, %v229_v23  ;;  %v247_v23 = vmul.f32 %v945_v17, %v945_v17  ;;  %v248_v27 = vmul.f32 %v950_v21, %v950_v21 }
  0x4b   : > { %v261_v33 = vadd.f32 %v260_v30, %v230_v26  ;;  %v955_v26 = vld [vmem:[%s810_s11 + $0xe0] sm:$0xff]  ;;  %v960_v30 = vld [vmem:[%s810_s11 + $0xe8] sm:$0xff] }
  0x4d   : > { %v262_v36 = vadd.f32 %v261_v33, %v231_v29 }
  0x4f   : > { %v263_v39 = vadd.f32 %v262_v36, %v232_v32  ;;  %v249_v32 = vmul.f32 %v955_v26, %v955_v26  ;;  %v250_v36 = vmul.f32 %v960_v30, %v960_v30 }
  0x51   : > { %v264_v42 = vadd.f32 %v263_v39, %v233_v35  ;;  %v965_v35 = vld [vmem:[%s810_s11 + $0xf0] sm:$0xff]  ;;  %v970_v39 = vld [vmem:[%s810_s11 + $0xf8] sm:$0xff] }
  0x53   : > { %v265_v45 = vadd.f32 %v264_v42, %v234_v38 }
  0x55   : > { %v266_v48 = vadd.f32 %v265_v45, %v235_v41  ;;  %v251_v41 = vmul.f32 %v965_v35, %v965_v35 }
  0x57   : > { %v267_v51 = vadd.f32 %v266_v48, %v236_v44  ;;  %v252_v44 = vmul.f32 %v970_v39, %v970_v39 }
  0x59   : > { %v268_v54 = vadd.f32 %v267_v51, %v237_v47 }
  0x5b   : > { %v269_v57 = vadd.f32 %v268_v54, %v238_v50 }
  0x5d   : > { %v270_v60 = vadd.f32 %v269_v57, %v239_v53 }
  0x5f   : > { %v271_v63 = vadd.f32 %v270_v60, %v240_v56 }
  0x61   : > { %v272_v6 = vadd.f32 %v271_v63, %v241_v59 }
  0x63   : > { %v273_v11 = vadd.f32 %v272_v6, %v242_v62 }
  0x65   : > { %v274_v15 = vadd.f32 %v273_v11, %v243_v5 }
  0x67   : > { %v275_v20 = vadd.f32 %v274_v15, %v244_v9 }
  0x69   : > { %v276_v24 = vadd.f32 %v275_v20, %v245_v14 }
  0x6b   : > { %v277_v29 = vadd.f32 %v276_v24, %v246_v18  ;;  %v310_v18 = vlaneseq }
  0x6d   : > { %v278_v33 = vadd.f32 %v277_v29, %v247_v23  ;;  %v311_v24 = vshrl.u32 %v310_v18, 7 }
  0x6f   : > { %v279_v38 = vadd.f32 %v278_v33, %v248_v27  ;;  %v306_v27 = vld [vmem:[%s1136_s1] sm:$0x1]  ;;  %v312_v33 = vsub.s32 0, %v311_v24 }
  0x71   : > { %v280_v42 = vadd.f32 %v279_v38, %v249_v32 }
  0x73   : > { %v281_v45 = vadd.f32 %v280_v42, %v250_v36 }
  0x75   : > { %v282_v47 = vadd.f32 %v281_v45, %v251_v41 }
  0x77   : > { %v283_v48 = vadd.f32 %v282_v47, %v252_v44 }
  0x79   : > { %v284_v50 = vrot.slane %v283_v48, 4 }
  0x7b   : > { %v285_v51 = vadd.f32 %v284_v50, %v283_v48 }
  0x7d   : > { %v286_v53 = vrot.slane %v285_v51, 2 }
  0x7f   : > { %v287_v54 = vadd.f32 %v286_v53, %v285_v51 }
  0x81   : > { %v288_v56 = vrot.slane %v287_v54, 1 }
  0x83   : > { %v289_v57 = vadd.f32 %v288_v56, %v287_v54 }
  0x85   : > { %572 = vrsqrt.f32 %v289_v57  ;;  %vm292_vm0 = vcmp.eq.f32.partialorder %v289_v57, inf  ;;  %v295_v60 = vand.u32 2147483648, %v289_v57  ;;  %vm294_vm1 = vcmp.eq.f32.partialorder %v289_v57, 0.0 }
  0x8f   : > { %v573_v59 = vpop.eup %572 }
  0x90   : > { %v291_v62 = vmul.f32 %v573_v59, %v289_v57 }
  0x92   : > { %v293_v63 = vsel %vm292_vm0, %v289_v57, %v291_v62 }
  0x93   : > { %v296_v5 = vsel %vm294_vm1, %v295_v60, %v293_v63 }
  0x94   : > { %297 = vadd.xlane.f32.xlu0 %v296_v5 }
 0x121   : > { %v298_v6 = vpop.xlane.xlu0 %297 }
 0x122   : > { %v299_v9 = vmul.f32 0.0078125, %v298_v6 }
 0x124   : > { %v300_v11 = vadd.f32 1e-06, %v299_v9 }
 0x126   : > { %574 = vrcp.f32 %v300_v11 }
 0x130   : > { %v575_v14 = vpop.eup %574 }
 0x131   : > { %v302_v15 = vmul.f32 %v575_v14, %v300_v11 }
 0x133   : > { %v303_v20 = vsub.f32 2.0, %v302_v15 }
 0x135   : > { %v304_v23 = vmul.f32 %v575_v14, %v303_v20 }
 0x137   : > { %v305_v29 = vmul.f32 %v304_v23, %v296_v5 }
 0x139   : > { %v307_v32 = vmul.f32 %v306_v27, %v305_v29 }
 0x13b   : > { %v308_v36 = vadd.f32 1.0, %v307_v32 }
 0x13d   : > { %v313_v38 = vrot.slane %v308_v36, %v312_v33 }
 0x13f   : > { %v315_v41 = vmul.f32 %v313_v38, %v817_v0  ;;  %v316_v42 = vmul.f32 %v313_v38, %v820_v1  ;;  %v317_v44 = vmul.f32 %v313_v38, %v823_v2  ;;  %v318_v45 = vmul.f32 %v313_v38, %v826_v3 }
 0x140   : > { %v319_v47 = vmul.f32 %v313_v38, %v835_v7  ;;  %v320_v48 = vmul.f32 %v313_v38, %v840_v10  ;;  %v321_v50 = vmul.f32 %v313_v38, %v845_v13  ;;  %v322_v51 = vmul.f32 %v313_v38, %v850_v16 }
 0x141   : > { %v323_v53 = vmul.f32 %v313_v38, %v855_v19  ;;  %v324_v54 = vmul.f32 %v313_v38, %v860_v22  ;;  %v325_v0 = vmul.f32 %v313_v38, %v865_v25  ;;  %v326_v1 = vmul.f32 %v313_v38, %v870_v28  ;;  %v1002_v25 = vld [vmem:[%s1137_s2] ss:$0 sm:$0xff] }
 0x142   : > { %v327_v2 = vmul.f32 %v313_v38, %v875_v31  ;;  %v328_v3 = vmul.f32 %v313_v38, %v880_v34  ;;  %v329_v7 = vmul.f32 %v313_v38, %v885_v37  ;;  %v330_v10 = vmul.f32 %v313_v38, %v890_v40 }
 0x143   : > { %v331_v13 = vmul.f32 %v313_v38, %v895_v43  ;;  %v332_v16 = vmul.f32 %v313_v38, %v900_v46  ;;  %v333_v19 = vmul.f32 %v313_v38, %v905_v49  ;;  %v334_v22 = vmul.f32 %v313_v38, %v910_v52 }
 0x144   : > { %v335_v28 = vmul.f32 %v313_v38, %v915_v55  ;;  %v336_v31 = vmul.f32 %v313_v38, %v920_v58  ;;  %v337_v34 = vmul.f32 %v313_v38, %v925_v61  ;;  %v338_v37 = vmul.f32 %v313_v38, %v930_v4 }
 0x145   : > { %v339_v40 = vmul.f32 %v313_v38, %v935_v8  ;;  %v340_v43 = vmul.f32 %v313_v38, %v940_v12  ;;  %v341_v46 = vmul.f32 %v313_v38, %v945_v17  ;;  %v342_v49 = vmul.f32 %v313_v38, %v950_v21 }
 0x146   : > { %v343_v52 = vmul.f32 %v313_v38, %v955_v26  ;;  %v344_v56 = vmul.f32 %v313_v38, %v960_v30  ;;  %v345_v55 = vmul.f32 %v313_v38, %v965_v35  ;;  %v346_v58 = vmul.f32 %v313_v38, %v970_v39 }
 0x147   : > { %v354_v61 = vadd.f32 %v1002_v25, %v315_v41  ;;  %v355_v4 = vadd.f32 %v1002_v25, %v316_v42  ;;  %v356_v8 = vadd.f32 %v1002_v25, %v317_v44  ;;  %v357_v12 = vadd.f32 %v1002_v25, %v318_v45 }
 0x148   : > { %v358_v17 = vadd.f32 %v1002_v25, %v319_v47  ;;  %v359_v21 = vadd.f32 %v1002_v25, %v320_v48  ;;  %v360_v26 = vadd.f32 %v1002_v25, %v321_v50  ;;  %v361_v30 = vadd.f32 %v1002_v25, %v322_v51 }
 0x149   : > { %v362_v35 = vadd.f32 %v1002_v25, %v323_v53  ;;  %v363_v39 = vadd.f32 %v1002_v25, %v324_v54  ;;  %v364_v57 = vadd.f32 %v1002_v25, %v325_v0  ;;  %v365_v59 = vadd.f32 %v1002_v25, %v326_v1  ;;  %386 = vst [vmem:[%s1030_s8] sm:$0xff] %v354_v61 }
 0x14a   : > { %387 = vst [vmem:[%s1030_s8 + $0x8] sm:$0xff] %v355_v4  ;;  %388 = vst [vmem:[%s1030_s8 + $0x10] sm:$0xff] %v356_v8  ;;  %v366_v60 = vadd.f32 %v1002_v25, %v327_v2  ;;  %v367_v62 = vadd.f32 %v1002_v25, %v328_v3  ;;  %v368_v63 = vadd.f32 %v1002_v25, %v329_v7 }
 0x14b   : > { %389 = vst [vmem:[%s1030_s8 + $0x18] sm:$0xff] %v357_v12  ;;  %v369_v5 = vadd.f32 %v1002_v25, %v330_v10  ;;  %390 = vst [vmem:[%s1030_s8 + $0x20] sm:$0xff] %v358_v17  ;;  %v370_v6 = vadd.f32 %v1002_v25, %v331_v13  ;;  %v371_v9 = vadd.f32 %v1002_v25, %v332_v16 }
 0x14c   : > { %391 = vst [vmem:[%s1030_s8 + $0x28] sm:$0xff] %v359_v21  ;;  %392 = vst [vmem:[%s1030_s8 + $0x30] sm:$0xff] %v360_v26  ;;  %v372_v11 = vadd.f32 %v1002_v25, %v333_v19  ;;  %v373_v14 = vadd.f32 %v1002_v25, %v334_v22  ;;  %v374_v15 = vadd.f32 %v1002_v25, %v335_v28 }
 0x14d   : > { %393 = vst [vmem:[%s1030_s8 + $0x38] sm:$0xff] %v361_v30  ;;  %394 = vst [vmem:[%s1030_s8 + $0x40] sm:$0xff] %v362_v35  ;;  %v375_v18 = vadd.f32 %v1002_v25, %v336_v31  ;;  %v376_v20 = vadd.f32 %v1002_v25, %v337_v34  ;;  %v377_v23 = vadd.f32 %v1002_v25, %v338_v37 }
 0x14e   : > { %395 = vst [vmem:[%s1030_s8 + $0x48] sm:$0xff] %v363_v39  ;;  %396 = vst [vmem:[%s1030_s8 + $0x50] sm:$0xff] %v364_v57  ;;  %v378_v24 = vadd.f32 %v1002_v25, %v339_v40  ;;  %v379_v27 = vadd.f32 %v1002_v25, %v340_v43  ;;  %v380_v29 = vadd.f32 %v1002_v25, %v341_v46 }
 0x14f   : > { %397 = vst [vmem:[%s1030_s8 + $0x58] sm:$0xff] %v365_v59  ;;  %398 = vst [vmem:[%s1030_s8 + $0x60] sm:$0xff] %v366_v60  ;;  %v381_v32 = vadd.f32 %v1002_v25, %v342_v49  ;;  %v382_v33 = vadd.f32 %v1002_v25, %v343_v52  ;;  %v383_v36 = vadd.f32 %v1002_v25, %v344_v56 }
 0x150   : > { %399 = vst [vmem:[%s1030_s8 + $0x68] sm:$0xff] %v367_v62  ;;  %400 = vst [vmem:[%s1030_s8 + $0x70] sm:$0xff] %v368_v63  ;;  %v384_v38 = vadd.f32 %v1002_v25, %v345_v55  ;;  %v385_v41 = vadd.f32 %v1002_v25, %v346_v58 }
 0x151   : > { %401 = vst [vmem:[%s1030_s8 + $0x78] sm:$0xff] %v369_v5  ;;  %402 = vst [vmem:[%s1030_s8 + $0x80] sm:$0xff] %v370_v6 }
 0x152   : > { %403 = vst [vmem:[%s1030_s8 + $0x88] sm:$0xff] %v371_v9  ;;  %404 = vst [vmem:[%s1030_s8 + $0x90] sm:$0xff] %v372_v11 }
 0x153   : > { %405 = vst [vmem:[%s1030_s8 + $0x98] sm:$0xff] %v373_v14  ;;  %406 = vst [vmem:[%s1030_s8 + $0xa0] sm:$0xff] %v374_v15 }
 0x154   : > { %407 = vst [vmem:[%s1030_s8 + $0xa8] sm:$0xff] %v375_v18  ;;  %408 = vst [vmem:[%s1030_s8 + $0xb0] sm:$0xff] %v376_v20 }
 0x155   : > { %409 = vst [vmem:[%s1030_s8 + $0xb8] sm:$0xff] %v377_v23  ;;  %410 = vst [vmem:[%s1030_s8 + $0xc0] sm:$0xff] %v378_v24 }
 0x156   : > { %411 = vst [vmem:[%s1030_s8 + $0xc8] sm:$0xff] %v379_v27  ;;  %412 = vst [vmem:[%s1030_s8 + $0xd0] sm:$0xff] %v380_v29 }
 0x157   : > { %413 = vst [vmem:[%s1030_s8 + $0xd8] sm:$0xff] %v381_v32  ;;  %414 = vst [vmem:[%s1030_s8 + $0xe0] sm:$0xff] %v382_v33 }
 0x158   : > { %415 = vst [vmem:[%s1030_s8 + $0xe8] sm:$0xff] %v383_v36  ;;  %416 = vst [vmem:[%s1030_s8 + $0xf0] sm:$0xff] %v384_v38 }
 0x159   : > { %417 = vst [vmem:[%s1030_s8 + $0xf8] sm:$0xff] %v385_v41 }
 0x15a   : > { %619 = shalt.err (!%p616_p2)
}
 0x15b   : > { %s620_s9 = scalar_lea.hbm %s1073_s22, 4096  ;;  %s624_s23 = scalar_lea.hbm %s1138_s3, 8192 }
 0x15c   : > { %p621_p4 = scmp.ne.s32.totalorder %s1073_s22, %s620_s9  ;;  %p625_p9 = scmp.lt.u32.totalorder %s1073_s22, %s1138_s3 }
 0x15d   : > { %p626_p1 = scmp.lt.u32.totalorder %s624_s23, %s620_s9  ;;  %p628_p6 = scmp.lt.u32.totalorder %s620_s9, %s1073_s22 }
 0x15e   : > { %p622_p5 = pnand %p621_p4, %p1145_p11 }
 0x15f   : > { %p627_p3 = por %p626_p1, %p625_p9 }
 0x160   : > { %p623_p7 = pneg %p622_p5 }
 0x161   : > { %p629_p12 = por %p628_p6, %p627_p3 }
 0x163   : > { %p630_p13 = pnand %p629_p12, %p623_p7 }
 0x165   : > { %633 = shalt.err (!%p630_p13)
}
 0x166   : > { %s678_s7 = smov 128   ;;  %s679_s8 = smov 8  }
 0x167   : > { %524 = dma.vmem_to_hbm [thread:$0]  (%p1145_p11), %s1075_s19, 4096, %s1073_s22, %s419_s26, %s678_s7, %s678_s7, %s679_s8  }
 0x168 PF: > { %s447_s17 = sand.u32 1, %s660_s12   ;;  %p1146_p8 = scmp.ne.s32.totalorder %s1143_s25, 0 }
 0x169   : > { %p1147_p10 = scmp.ge.s32.totalorder %s672_s15, 2  ;;  %s448_s16 = scalar_lea.sflag [#allocation4], %s447_s17 }
 0x16b   : > { %p531_p0 = pnand %p1147_p10, %p1146_p8 }
 0x16d   : > { %655 = dma.done.wait (!%p531_p0), %s448_s16, 4096  }
 0x16e   : > { %657 = vsyncadd (!%p531_p0), %s448_s16, 4294963200  ;;  %p16_p2 = scmp.ge.s32.totalorder %s725_s18, 4   ;;  %s1148_s12 = smov %s664_s13 }
 0x16f   : > { %s1149_s13 = smov %s668_s14  ;;  %s1150_s14 = smov %s737_s21 }
 0x170   : > { %s1151_s15 = smov %s725_s18  ;;  %18 = sbr.rel (!%p16_p2) target bundleno = 5 (0x5), region = 77 }
 0x177   :  { %453 = vsyncpa [#allocation3], 1 }
 0x178   :  { %455 = vsyncpa [#allocation3 + $0x1], 1 }
 0x179   :  { %456 = vsyncpa [#allocation4], 1 }
 0x17a   :  { %458 = vsyncpa [#allocation4 + $0x1], 1 }

</bundles_post_ra>
